<compile_context>
chip_gen: v6e
topology: v6e:2x2x1
jax: 0.10.0
libtpu: 0.0.40
codegen_flags: <defaults>
</compile_context>

<pallas_src>
import math
import functools

import jax
import jax.numpy as jnp
from jax.experimental import pallas as pl
from jax.experimental.pallas import tpu as pltpu


# ---------------------------------------------------------------------------
# Kernel: mean-center rows, one folded matmul, add bias + mean back.
# ---------------------------------------------------------------------------
def hadl_kernel(x_ref, m_ref, bias_ref, o_ref):
    x = x_ref[...].astype(jnp.float32)                       # [TR, L]
    mean = jnp.mean(x, axis=-1, keepdims=True)               # [TR, 1]   (seq_mean)
    xc = x - mean
    # Folded Haar * DCT/N * A * B projection, f32 accumulation on the MXU.
    z = jnp.dot(xc, m_ref[...], preferred_element_type=jnp.float32)  # [TR, P_pad]
    o_ref[...] = z + bias_ref[...] + mean                    # bias + seq_mean add-back


# ---------------------------------------------------------------------------
# Static transform matrices (constant-folded at trace time).
# ---------------------------------------------------------------------------
def make_haar_matrix(seq_len, enable_haar):
    """[L, N] matrix s.t. xc @ H == conv1d(pad(xc), [1,1]/sqrt(2), stride=2)."""
    if not enable_haar:
        return jnp.eye(seq_len, dtype=jnp.float32)
    n_out = seq_len // 2 + 1 if seq_len % 2 != 0 else seq_len // 2
    idx = jnp.arange(seq_len)
    H = jnp.zeros((seq_len, n_out), dtype=jnp.float32)
    H = H.at[idx, idx // 2].set(1.0 / math.sqrt(2.0))
    return H


def make_dct_matrix(n, enable_dct):
    """[N, N] matrix s.t. h @ Dt == dct(h, type=2, norm='ortho', axis=-1) / N."""
    if not enable_dct:
        return jnp.eye(n, dtype=jnp.float32)
    k = jnp.arange(n, dtype=jnp.float32)[:, None]   # output frequency index
    m = jnp.arange(n, dtype=jnp.float32)[None, :]   # input sample index
    D = jnp.cos(jnp.pi * (2.0 * m + 1.0) * k / (2.0 * n))
    scale = jnp.where(k == 0, jnp.sqrt(1.0 / n), jnp.sqrt(2.0 / n))
    D = D * scale                                   # dct(h)[k] = sum_m h[m] D[k, m]
    return (D.T / n).astype(jnp.float32)            # h @ Dt, /N folded in


def init_params(key, in_len, pred_len, rank):
    """Deterministic stand-ins for LowRank's kaiming_uniform_/uniform_ init."""
    kA, kB, kb = jax.random.split(key, 3)
    bound_a = math.sqrt(6.0 / rank)      # kaiming_uniform_ fan_in = size(1)
    bound_b = math.sqrt(6.0 / pred_len)
    A = jax.random.uniform(kA, (in_len, rank), jnp.float32, -bound_a, bound_a)
    B = jax.random.uniform(kB, (rank, pred_len), jnp.float32, -bound_b, bound_b)
    b = jax.random.uniform(kb, (pred_len,), jnp.float32, 0.0, 1.0)
    return {"A": A, "B": B, "b": b}


def _round_up(x, m):
    return ((x + m - 1) // m) * m


# ---------------------------------------------------------------------------
# Wrapper
# ---------------------------------------------------------------------------
@functools.partial(jax.jit, static_argnames=("enable_haar", "enable_dct",
                                             "activation_dtype"))
def hadl_forward(x, params, *, enable_haar=True, enable_dct=True,
                 activation_dtype=jnp.float32):
    # x: [B, seq_len, features]  ->  returns [B, pred_len, features]
    Bsz, L, F = x.shape
    A, Bm, bias = params["A"], params["B"], params["b"]
    P = Bm.shape[1]

    # Constant-fold the whole static transform chain: Haar -> DCT/N -> A -> B.
    hp = jax.lax.Precision.HIGHEST
    H = make_haar_matrix(L, enable_haar)                     # [L, N]
    Dt = make_dct_matrix(H.shape[1], enable_dct)             # [N, N]
    M = jnp.dot(H, Dt, precision=hp)
    M = jnp.dot(M, A.astype(jnp.float32), precision=hp)
    M = jnp.dot(M, Bm.astype(jnp.float32), precision=hp)     # [L, P]

    # Lane-dense output: pad last dim to a multiple of 128 (unmasked stores).
    P_pad = _round_up(P, 128)
    M = jnp.pad(M, ((0, 0), (0, P_pad - P)))
    bias2 = jnp.pad(bias.astype(jnp.float32).reshape(1, P), ((0, 0), (0, P_pad - P)))

    # Channel-major rows: [R, L], R = B*features.
    xr = jnp.transpose(x, (0, 2, 1)).reshape(Bsz * F, L).astype(activation_dtype)
    R = Bsz * F

    # Row tiling: multiple of 8 sublanes, up to 512 rows for good HBM roofline.
    TILE_R = min(512, _round_up(R, 8))
    R_pad = _round_up(R, TILE_R)
    if R_pad != R:
        xr = jnp.pad(xr, ((0, R_pad - R), (0, 0)))

    itemsize = jnp.dtype(activation_dtype).itemsize
    # 2x double-buffered x tiles + 2x output tiles + resident weights (+headroom).
    need = (2 * TILE_R * L * itemsize
            + 2 * TILE_R * P_pad * 4
            + L * P_pad * 4 + P_pad * 4)
    vmem_bytes = int(min(max(2 * need, 16 << 20), 32 << 20))

    cost = pl.CostEstimate(
        flops=2 * R_pad * L * P_pad,
        transcendentals=0,
        bytes_accessed=R_pad * L * itemsize + R_pad * P_pad * 4
                       + L * P_pad * 4 + P_pad * 4,
    )

    out = pl.pallas_call(
        hadl_kernel,
        out_shape=jax.ShapeDtypeStruct((R_pad, P_pad), jnp.float32),
        grid=(R_pad // TILE_R,),
        in_specs=[
            pl.BlockSpec((TILE_R, L), lambda i: (i, 0)),     # streamed activations
            pl.BlockSpec((L, P_pad), lambda i: (0, 0)),      # resident folded weight
            pl.BlockSpec((1, P_pad), lambda i: (0, 0)),      # resident bias
        ],
        out_specs=pl.BlockSpec((TILE_R, P_pad), lambda i: (i, 0)),
        compiler_params=pltpu.CompilerParams(
            dimension_semantics=("parallel",),               # megacore-shardable rows
            vmem_limit_bytes=vmem_bytes),
        cost_estimate=cost,
    )(xr, M, bias2)

    out = out[:R, :P]                                        # drop row / lane padding
    return jnp.transpose(out.reshape(Bsz, F, P), (0, 2, 1))


# ---------------------------------------------------------------------------
# Pure-JAX reference mirroring the PyTorch forward, for validation.
# ---------------------------------------------------------------------------
def hadl_reference(x, params, *, enable_haar=True, enable_dct=True):
    hp = jax.lax.Precision.HIGHEST
    A, Bm, bias = params["A"], params["B"], params["b"]
    xp = jnp.transpose(x, (0, 2, 1)).astype(jnp.float32)      # [B, C, L]
    mean = jnp.mean(xp, axis=-1, keepdims=True)
    xc = xp - mean
    if enable_haar:
        if xc.shape[-1] % 2 != 0:
            xc = jnp.pad(xc, ((0, 0), (0, 0), (0, 1)))
        xc = (xc[..., 0::2] + xc[..., 1::2]) / math.sqrt(2.0)
    if enable_dct:
        n = xc.shape[-1]
        k = jnp.arange(n, dtype=jnp.float32)[:, None]
        m = jnp.arange(n, dtype=jnp.float32)[None, :]
        D = jnp.cos(jnp.pi * (2.0 * m + 1.0) * k / (2.0 * n))
        D = D * jnp.where(k == 0, jnp.sqrt(1.0 / n), jnp.sqrt(2.0 / n))
        xc = jnp.einsum("bcl,kl->bck", xc, D, precision=hp) / n
    out = jnp.einsum("bck,kr->bcr", xc, A, precision=hp)
    out = jnp.einsum("bcr,rp->bcp", out, Bm, precision=hp) + bias
    out = out + mean
    return jnp.transpose(out, (0, 2, 1))


if __name__ == "__main__":
    # Small shapes consistent with the module's forward: x is [Batch, seq_len, features].
    batch, seq_len, features = 2, 16, 4
    pred_len, rank = 8, 30

    key = jax.random.PRNGKey(0)
    kx, kp = jax.random.split(key)
    x = jax.random.normal(kx, (batch, seq_len, features), dtype=jnp.float32)

    in_len = seq_len // 2 + 1 if seq_len % 2 != 0 else seq_len // 2
    params = init_params(kp, in_len, pred_len, rank)

    out = hadl_forward(x, params, enable_haar=True, enable_dct=True)
    out = jax.block_until_ready(out)

    ref = hadl_reference(x, params, enable_haar=True, enable_dct=True)
    assert out.shape == (batch, pred_len, features), out.shape
    err = float(jnp.max(jnp.abs(out - ref)))
    assert jnp.allclose(out, ref, atol=1e-3, rtol=1e-3), err

    print("KERNEL_OK")
</pallas_src>

<mosaic_0001>
module attributes {stable_mosaic.version = 11 : i64} {
  func.func @hadl_kernel(%arg0: i32, %arg1: memref<8x16xf32, #tpu.memory_space<vmem>>, %arg2: memref<16x128xf32, #tpu.memory_space<vmem>>, %arg3: memref<1x128xf32, #tpu.memory_space<vmem>>, %arg4: memref<8x128xf32, #tpu.memory_space<vmem>>) attributes {dimension_semantics = [#tpu.dimension_semantics<parallel>], iteration_bounds = array<i64: 1>, scalar_prefetch = 0 : i64, scratch_operands = 0 : i64, tpu.core_type = #tpu.core_type<tc>, window_params = [{transform_indices = @transform_0, window_bounds = array<i64: 8, 16>}, {pipeline_mode = #tpu.pipeline_mode<synchronous>, transform_indices = @transform_1, window_bounds = array<i64: 16, 128>}, {pipeline_mode = #tpu.pipeline_mode<synchronous>, transform_indices = @transform_2, window_bounds = array<i64: 1, 128>}, {transform_indices = @transform_3, window_bounds = array<i64: 8, 128>}]} {
    %c0 = arith.constant 0 : index
    %c0_0 = arith.constant 0 : index
    %0 = vector.load %arg1[%c0, %c0_0] : memref<8x16xf32, #tpu.memory_space<vmem>>, vector<8x16xf32>
    %cst = arith.constant dense<0.000000e+00> : vector<8xf32>
    %1 = vector.multi_reduction <add>, %0, %cst [1] : vector<8x16xf32> to vector<8xf32>
    %2 = vector.shape_cast %1 : vector<8xf32> to vector<8x1xf32>
    %cst_1 = arith.constant 1.600000e+01 : f32
    %3 = vector.broadcast %cst_1 : f32 to vector<8x1xf32>
    %4 = arith.divf %2, %3 : vector<8x1xf32>
    %5 = vector.broadcast %4 : vector<8x1xf32> to vector<8x16xf32>
    %6 = arith.subf %0, %5 : vector<8x16xf32>
    %c0_2 = arith.constant 0 : index
    %c0_3 = arith.constant 0 : index
    %7 = vector.load %arg2[%c0_2, %c0_3] : memref<16x128xf32, #tpu.memory_space<vmem>>, vector<16x128xf32>
    %cst_4 = arith.constant dense<0.000000e+00> : vector<8x128xf32>
    %8 = tpu.matmul %6, %7, %cst_4 {dimension_numbers = #tpu.dot_dimension_numbers<[1], [0], [0], [1], [0, 0, 1, 1], [], []>} : vector<8x16xf32>, vector<16x128xf32>, vector<8x128xf32> -> vector<8x128xf32>
    %c0_5 = arith.constant 0 : index
    %c0_6 = arith.constant 0 : index
    %9 = vector.load %arg3[%c0_5, %c0_6] : memref<1x128xf32, #tpu.memory_space<vmem>>, vector<1x128xf32>
    %10 = vector.broadcast %9 : vector<1x128xf32> to vector<8x128xf32>
    %11 = arith.addf %8, %10 : vector<8x128xf32>
    %12 = vector.broadcast %4 : vector<8x1xf32> to vector<8x128xf32>
    %13 = arith.addf %11, %12 : vector<8x128xf32>
    %c0_7 = arith.constant 0 : index
    %c0_8 = arith.constant 0 : index
    %14 = vector.load %arg4[%c0_7, %c0_8] : memref<8x128xf32, #tpu.memory_space<vmem>>, vector<8x128xf32>
    tpu.vector_store %arg4[%c0_7, %c0_8], %13 {strides = array<i32>} : memref<8x128xf32, #tpu.memory_space<vmem>>, vector<8x128xf32>,
    return
  }
  func.func @transform_0(%arg0: i32) -> (i32, i32) {
    %c0_i32 = arith.constant 0 : i32
    %c0_i32_0 = arith.constant 0 : i32
    return %arg0, %c0_i32 : i32, i32
  }
  func.func @transform_1(%arg0: i32) -> (i32, i32) {
    %c0_i32 = arith.constant 0 : i32
    %c0_i32_0 = arith.constant 0 : i32
    %c0_i32_1 = arith.constant 0 : i32
    return %c0_i32, %c0_i32_0 : i32, i32
  }
  func.func @transform_2(%arg0: i32) -> (i32, i32) {
    %c0_i32 = arith.constant 0 : i32
    %c0_i32_0 = arith.constant 0 : i32
    %c0_i32_1 = arith.constant 0 : i32
    return %c0_i32, %c0_i32_0 : i32, i32
  }
  func.func @transform_3(%arg0: i32) -> (i32, i32) {
    %c0_i32 = arith.constant 0 : i32
    %c0_i32_0 = arith.constant 0 : i32
    return %arg0, %c0_i32 : i32, i32
  }
}

</mosaic_0001>

<bundles_post_ra>
// kernel: hadl_forward.1
= control target key start
LH: loop header
LB: loop body
LE: loop exit
PB: predicated region body
PF: predicated region fallthrough
CT: control target
= control target key end

     0   :  { %vm16_vm0 = vcmask 130048   ;;  %s198_s0 = inlined_call_operand.vmem [shape: f32[8,16], index: 0, kind: input, shape index: {}]   ;;  %s199_s1 = inlined_call_operand.vmem [shape: f32[16,128], index: 1, kind: input, shape index: {}]   ;;  %s200_s2 = inlined_call_operand.vmem [shape: f32[1,128], index: 2, kind: input, shape index: {}]   ;;  %s201_s3 = inlined_call_operand.hbm [shape: f32[8,128], index: 3, kind: output, shape index: {}]  }
   0x1   :  { %v15_v0 = vld [vmem:[%s198_s0] sm:$0xff] }
   0x2   :  { %8 = vsyncpa [#allocation3], 0  ;;  %v17_v1 = vsel %vm16_vm0, %v15_v0, 0.0  ;;  %v158_v2 = vmov 0.0   ;;  %v24_v3 = vld [vmem:[%s199_s1 + $0x8] sm:$0xff]  ;;  %v23_v4 = vld [vmem:[%s199_s1] sm:$0xff] }
   0x3   :  { %18 = vadd.xlane.f32.xlu0 %v17_v1  ;;  %126 = vmatprep.subr.mxu0 %v158_v2  ;;  %vm159_vm1 = vmmov 0   ;;  %v121_v8 = vld [vmem:[%s200_s2] ss:$0 sm:$0xff]  ;;  %s160_s19 = smov [#allocation2]  }
   0x4   :  { %127 = vmatpush3.msra.mxu0 %v24_v3  ;;  %130 = vmatprep.mubr.msk.f32.mxu0 %vm159_vm1, %v158_v2  ;;  %s113_s20 = sshll.u32 %s160_s19, 4  ;;  %s114_s20 = int_to_ptr.vmem [resolvable:$true] %s113_s20 }
   0x5   :  { %128 = vmatprep.subr.mxu0 %v158_v2  ;;  %s136_s1 = scalar_lea.vmem %s114_s20, 128  ;;  %p141_p1 = scmp.lt.s32.totalorder %s114_s20, %s114_s20 }
   0x6   :  { %129 = vmatpush3.msra.mxu0 %v23_v4  ;;  %p137_p0 = scmp.ne.s32.totalorder %s114_s20, %s136_s1  ;;  %p142_p2 = scmp.lt.s32.totalorder %s136_s1, %s136_s1 }
   0x8   :  { %p143_p3 = por %p142_p2, %p141_p1 }
   0xa   :  { %p144_p4 = pnand %p143_p3, %p137_p0 }
  0x8c   :  { %v19_v5 = vpop.xlane.xlu0 %18 }
  0x8d   :  { %v21_v6 = vmul.f32 0.0625, %v19_v5 }
  0x8f   :  { %v22_v7 = vsub.f32 %v15_v0, %v21_v6 }
  0x91   :  { %131 = vmatmul.mubr.msk.f32.vlgmr.msra.gmra.mxu0 %vm16_vm0, %v22_v7 }
 0x151   :  { %v101_v9 = vpop.f32.mrf.mxu0 }
 0x152   :  { %v102_v10 = vadd.f32 %v121_v8, %v101_v9 }
 0x153   :  { %v132_v11 = vpop.f32.mrf.mxu0 }
 0x154   :  { %v105_v12 = vadd.f32 %v102_v10, %v21_v6 }
 0x156   :  { %106 = vst [vmem:[#allocation2] sm:$0xff] %v105_v12 }
 0x157   :  { %147 = shalt.err (!%p144_p4)
}
 0x158   :  { %116 = dma.vmem_to_hbm [thread:$0]  %s114_s20, 128, %s201_s3, [#allocation3]  }
 0x159   :  { %156 = dma.done.wait [#allocation3], 128  }
 0x15a   :  { %157 = vsyncadd [#allocation3], 4294967168 }
 0x15b   :  { %120 = vsyncpa [#allocation3], 1 }

</bundles_post_ra>
